<compile_context>
chip_gen: v6e
topology: v6e:2x2x1
jax: 0.10.0
libtpu: 0.0.40
codegen_flags: <defaults>
</compile_context>

<pallas_src>
import math

import numpy as np
import jax
import jax.numpy as jnp
from jax.experimental import pallas as pl
from jax.experimental.pallas import tpu as pltpu


_EPS = 1e-6
_LOG_EPS = math.log(_EPS)           # lower clamp for log-prob at target
_LOG_1M_EPS = math.log1p(-_EPS)     # upper clamp for log-prob at target


# ----------------------------------------------------------------------------
# Parameter setup (mirrors the PyTorch __init__ helpers, deterministic)
# ----------------------------------------------------------------------------
def get_binary_omega_list(omega, minority_class=1):
    if minority_class == 1:
        weights = [1.0 - omega, omega]
    else:
        weights = [omega, 1.0 - omega]
    return np.asarray(weights, dtype=np.float32)


def get_delta_list(class_dist, gamma):
    temp = (1.0 / np.asarray(class_dist, dtype=np.float64)) ** gamma
    return (temp / np.min(temp)).astype(np.float32)


def get_iota_list(class_dist, tau):
    class_dist = np.asarray(class_dist, dtype=np.float64)
    cls_probs = class_dist / np.sum(class_dist)
    return (tau * np.log(cls_probs)).astype(np.float32)


def get_omega_list(class_dist, k=1):
    w = 1.0 / np.asarray(class_dist, dtype=np.float64) ** k
    w = w / np.sum(w) * len(class_dist)
    return w.astype(np.float32)


def make_vskl_params(class_dist, omega=0.5, gamma=0.3, tau=1.0):
    if len(class_dist) == 2:
        omega_list = get_binary_omega_list(omega)
    else:
        omega_list = get_omega_list(class_dist, k=1)
    delta_list = get_delta_list(class_dist, gamma)
    iota_list = get_iota_list(class_dist, tau)
    return (jnp.asarray(delta_list), jnp.asarray(iota_list),
            jnp.asarray(omega_list))


# ----------------------------------------------------------------------------
# Pallas kernel: one (C, BLK_N) slab -> three partial sums written to out[i].
# Layout: class on sublanes, batch on lanes (lane-dense for small C).
# ----------------------------------------------------------------------------
def _vskl_block_kernel(n_ref, x_ref, tgt_ref, params_ref, out_ref):
    c, blk = x_ref.shape
    i = pl.program_id(0)

    x = x_ref[...].astype(jnp.float32)            # (C, B)
    delta = params_ref[:, 0:1]                    # (C, 1)
    iota_ = params_ref[:, 1:2]                    # (C, 1)
    omega = params_ref[:, 2:3]                    # (C, 1)

    adj = x * delta + iota_                       # VS logit adjustment
    m = jnp.max(adj, axis=0, keepdims=True)       # (1, B)  per-sample max
    z = adj - m
    lse = jnp.log(jnp.sum(jnp.exp(z), axis=0, keepdims=True))   # (1, B)

    # one-hot(target) via sublane-iota compare; reused for both the target
    # logit gather and the in-kernel omega[target] gather (no streamed weights).
    tgt = tgt_ref[...]                            # (1, B) int32
    cls = jax.lax.broadcasted_iota(jnp.int32, (c, blk), 0)
    one_hot = (cls == tgt).astype(jnp.float32)    # (C, B)

    z_y = jnp.sum(z * one_hot, axis=0, keepdims=True)      # (1, B)
    w = jnp.sum(one_hot * omega, axis=0, keepdims=True)    # (1, B)

    logp_y = z_y - lse                            # log softmax @ target
    nll = -logp_y
    kl = -jnp.clip(logp_y, _LOG_EPS, _LOG_1M_EPS)  # == -log(clamp(softmax))

    # Ragged batch tail: lanes >= n hold garbage (no host-side pad), so mask
    # with where (multiply-by-mask would let inf/NaN through as NaN).
    lane = jax.lax.broadcasted_iota(jnp.int32, (1, blk), 1)
    valid = (i * blk + lane) < n_ref[0]

    s_wnll = jnp.sum(jnp.where(valid, w * nll, 0.0), axis=1, keepdims=True)
    s_w = jnp.sum(jnp.where(valid, w, 0.0), axis=1, keepdims=True)
    s_kl = jnp.sum(jnp.where(valid, kl, 0.0), axis=1, keepdims=True)

    # Per-block partials tile: row 0 = sum w*nll, row 1 = sum w, row 2 = sum kl.
    row = jax.lax.broadcasted_iota(jnp.int32, (8, 128), 0)
    tile = jnp.where(row == 0, s_wnll,
           jnp.where(row == 1, s_w,
           jnp.where(row == 2, s_kl, jnp.zeros((8, 128), jnp.float32))))
    out_ref[0] = tile


# ----------------------------------------------------------------------------
# Wrapper
# ----------------------------------------------------------------------------
def _round_up(a, b):
    return ((a + b - 1) // b) * b


def _pick_block_n(n, c):
    # Size the tile so each (C, block_n) f32 intermediate is ~1 MiB (in the
    # review's recommended 1-4 MiB logits-tile range for C=4 f32) while the
    # double-buffered input plus a handful of live f32 temporaries stays well
    # inside v7x's 64 MiB VMEM.
    if n <= 128:
        return n                     # single tiny full-batch block
    target_f32_bytes = 1 << 20
    blk = max(1, target_f32_bytes // max(1, c * 4))
    blk = max(512, (blk // 128) * 128)
    blk = min(blk, _round_up(n, 128))
    return max(blk, 128)


def vskl_loss(x, target, delta_list, iota_list, omega_list, kl_lambda=0.9,
              block_n=None, x_is_transposed=False):
    """VSKL loss. x: (N, C) logits, or (C, N) if x_is_transposed=True (which
    skips the host-side transpose copy). target: (N,) integer class ids."""
    if x_is_transposed:
        c, n = x.shape
        x_t = x
    else:
        n, c = x.shape
        # TODO(synk): extra HBM pass; prefer producing [C, N] upstream.
        x_t = x.T

    if block_n is None:
        block_n = _pick_block_n(n, c)
    assert block_n % 128 == 0 or block_n == n, (
        "block_n must be a multiple of 128 (lane axis) or the full batch")

    num_blocks = pl.cdiv(n, block_n)

    tgt = target.astype(jnp.int32).reshape(1, n)              # free reshape
    params = jnp.stack(
        [jnp.asarray(delta_list, jnp.float32),
         jnp.asarray(iota_list, jnp.float32),
         jnp.asarray(omega_list, jnp.float32)], axis=1)        # (C, 3)
    n_arr = jnp.asarray([n], dtype=jnp.int32)                  # scalar prefetch

    in_bytes = c * block_n * jnp.dtype(x_t.dtype).itemsize
    f32_bytes = c * block_n * 4
    vmem_limit = int(min(56 << 20, max(40 << 20, 8 * in_bytes + 32 * f32_bytes)))

    partials = pl.pallas_call(
        _vskl_block_kernel,
        out_shape=jax.ShapeDtypeStruct((num_blocks, 8, 128), jnp.float32),
        grid_spec=pltpu.PrefetchScalarGridSpec(
            num_scalar_prefetch=1,
            grid=(num_blocks,),
            in_specs=[
                pl.BlockSpec((c, block_n), lambda i, n_s: (0, i)),  # logits^T
                pl.BlockSpec((1, block_n), lambda i, n_s: (0, i)),  # targets
                pl.BlockSpec((c, 3), lambda i, n_s: (0, 0)),        # delta/iota/omega
            ],
            out_specs=pl.BlockSpec((1, 8, 128), lambda i, n_s: (i, 0, 0)),
        ),
        compiler_params=pltpu.CompilerParams(
            # No carried state -> batch axis is truly parallel (dual-TC on v7x).
            dimension_semantics=("parallel",),
            vmem_limit_bytes=vmem_limit,
        ),
    )(n_arr, x_t, tgt, params)

    # Tiny cross-block reduce + blend in plain JAX (matches torch reduction
    # semantics: weighted-mean CE and batchmean KL).
    s_wnll = jnp.sum(partials[:, 0, 0])
    s_w = jnp.sum(partials[:, 1, 0])
    s_kl = jnp.sum(partials[:, 2, 0])
    vs_loss = s_wnll / s_w            # no zero-weight guard, same as reference
    kl_loss = s_kl / n
    return kl_lambda * vs_loss + (1.0 - kl_lambda) * kl_loss


# ----------------------------------------------------------------------------
# Pure-JAX reference (mirrors the PyTorch forward exactly)
# ----------------------------------------------------------------------------
def vskl_loss_ref(x, target, delta_list, iota_list, omega_list, kl_lambda=0.9):
    n, c = x.shape
    output = x.astype(jnp.float32) * delta_list + iota_list
    logp = jax.nn.log_softmax(output, axis=1)
    one_hot = jax.nn.one_hot(target, c, dtype=jnp.float32)
    nll = -jnp.sum(logp * one_hot, axis=1)
    w = omega_list[target]
    vs_loss = jnp.sum(w * nll) / jnp.sum(w)
    eps = 1e-6
    probs = jnp.clip(jnp.exp(logp), eps, 1.0 - eps)
    kl_loss = jnp.sum(one_hot * (-jnp.log(probs))) / n
    return kl_lambda * vs_loss + (1.0 - kl_lambda) * kl_loss


# ----------------------------------------------------------------------------
if __name__ == "__main__":
    # Synthetic multi-class imbalanced setup: 4 classes.
    class_dist = [100, 50, 30, 20]
    omega, gamma, tau, kl_lambda = 0.5, 0.3, 1.0, 0.9
    delta_list, iota_list, omega_list = make_vskl_params(
        class_dist, omega=omega, gamma=gamma, tau=tau)
    C = len(class_dist)

    # Primary small test (batch=8, classes=4): single full-batch block.
    key = jax.random.PRNGKey(0)
    kx, kt = jax.random.split(key)
    N = 8
    x = jax.random.normal(kx, (N, C), dtype=jnp.float32)
    target = jax.random.randint(kt, (N,), 0, C, dtype=jnp.int32)

    loss = jax.block_until_ready(
        vskl_loss(x, target, delta_list, iota_list, omega_list,
                  kl_lambda=kl_lambda))
    ref = vskl_loss_ref(x, target, delta_list, iota_list, omega_list,
                        kl_lambda=kl_lambda)
    assert jnp.allclose(loss, ref, rtol=1e-5, atol=1e-5), (loss, ref)

    # Multi-block + ragged-tail test: N=300 with forced 128-lane blocks ->
    # 3 parallel grid steps, 84 garbage tail lanes masked in-kernel (no pad).
    kx2, kt2 = jax.random.split(jax.random.PRNGKey(1))
    N2 = 300
    x2 = jax.random.normal(kx2, (N2, C), dtype=jnp.float32)
    t2 = jax.random.randint(kt2, (N2,), 0, C, dtype=jnp.int32)
    loss2 = jax.block_until_ready(
        vskl_loss(x2, t2, delta_list, iota_list, omega_list,
                  kl_lambda=kl_lambda, block_n=128))
    ref2 = vskl_loss_ref(x2, t2, delta_list, iota_list, omega_list,
                         kl_lambda=kl_lambda)
    assert jnp.allclose(loss2, ref2, rtol=1e-5, atol=1e-5), (loss2, ref2)

    # Pre-transposed [C, N] logits path (skips the host-side transpose copy).
    loss3 = jax.block_until_ready(
        vskl_loss(x2.T, t2, delta_list, iota_list, omega_list,
                  kl_lambda=kl_lambda, block_n=128, x_is_transposed=True))
    assert jnp.allclose(loss3, ref2, rtol=1e-5, atol=1e-5), (loss3, ref2)

    print("KERNEL_OK")
</pallas_src>

<mosaic_0001>
module attributes {stable_mosaic.version = 11 : i64} {
  func.func @_vskl_block_kernel(%arg0: i32, %arg1: memref<1xi32, #tpu.memory_space<smem>>, %arg2: memref<4x8xf32, #tpu.memory_space<vmem>>, %arg3: memref<1x8xi32, #tpu.memory_space<vmem>>, %arg4: memref<4x3xf32, #tpu.memory_space<vmem>>, %arg5: memref<1x8x128xf32, #tpu.memory_space<vmem>>) attributes {dimension_semantics = [#tpu.dimension_semantics<parallel>], iteration_bounds = array<i64: 1>, scalar_prefetch = 1 : i64, scratch_operands = 0 : i64, tpu.core_type = #tpu.core_type<tc>, window_params = [{transform_indices = @transform_0, window_bounds = array<i64: 4, 8>}, {transform_indices = @transform_1, window_bounds = array<i64: 1, 8>}, {pipeline_mode = #tpu.pipeline_mode<synchronous>, transform_indices = @transform_2, window_bounds = array<i64: 4, 3>}, {transform_indices = @transform_3, window_bounds = array<i64: 1, 8, 128>}]} {
    %c0 = arith.constant 0 : index
    %c0_0 = arith.constant 0 : index
    %0 = vector.load %arg2[%c0, %c0_0] : memref<4x8xf32, #tpu.memory_space<vmem>>, vector<4x8xf32>
    %c0_1 = arith.constant 0 : index
    %c0_2 = arith.constant 0 : index
    %1 = vector.load %arg4[%c0_1, %c0_2] : memref<4x3xf32, #tpu.memory_space<vmem>>, vector<4x1xf32>
    %c0_3 = arith.constant 0 : index
    %c1 = arith.constant 1 : index
    %2 = vector.load %arg4[%c0_3, %c1] : memref<4x3xf32, #tpu.memory_space<vmem>>, vector<4x1xf32>
    %c0_4 = arith.constant 0 : index
    %c2 = arith.constant 2 : index
    %3 = vector.load %arg4[%c0_4, %c2] : memref<4x3xf32, #tpu.memory_space<vmem>>, vector<4x1xf32>
    %4 = vector.broadcast %1 : vector<4x1xf32> to vector<4x8xf32>
    %5 = arith.mulf %0, %4 : vector<4x8xf32>
    %6 = vector.broadcast %2 : vector<4x1xf32> to vector<4x8xf32>
    %7 = arith.addf %5, %6 : vector<4x8xf32>
    %cst = arith.constant dense<0xFF800000> : vector<8xf32>
    %8 = vector.multi_reduction <maximumf>, %7, %cst [0] : vector<4x8xf32> to vector<8xf32>
    %9 = vector.shape_cast %8 : vector<8xf32> to vector<1x8xf32>
    %10 = vector.broadcast %9 : vector<1x8xf32> to vector<4x8xf32>
    %11 = arith.subf %7, %10 : vector<4x8xf32>
    %12 = math.exp %11 : vector<4x8xf32>
    %cst_5 = arith.constant dense<0.000000e+00> : vector<8xf32>
    %13 = vector.multi_reduction <add>, %12, %cst_5 [0] : vector<4x8xf32> to vector<8xf32>
    %14 = vector.shape_cast %13 : vector<8xf32> to vector<1x8xf32>
    %15 = math.log %14 : vector<1x8xf32>
    %c0_6 = arith.constant 0 : index
    %c0_7 = arith.constant 0 : index
    %16 = vector.load %arg3[%c0_6, %c0_7] : memref<1x8xi32, #tpu.memory_space<vmem>>, vector<1x8xi32>
    %17 = tpu.iota {dimensions = array<i32: 0>} : vector<4x8xi32>
    %18 = vector.broadcast %16 : vector<1x8xi32> to vector<4x8xi32>
    %19 = arith.cmpi eq, %17, %18 : vector<4x8xi32>
    %20 = arith.extui %19 : vector<4x8xi1> to vector<4x8xi32>
    %21 = arith.sitofp %20 : vector<4x8xi32> to vector<4x8xf32>
    %22 = arith.mulf %11, %21 : vector<4x8xf32>
    %cst_8 = arith.constant dense<0.000000e+00> : vector<8xf32>
    %23 = vector.multi_reduction <add>, %22, %cst_8 [0] : vector<4x8xf32> to vector<8xf32>
    %24 = vector.shape_cast %23 : vector<8xf32> to vector<1x8xf32>
    %25 = vector.broadcast %3 : vector<4x1xf32> to vector<4x8xf32>
    %26 = arith.mulf %21, %25 : vector<4x8xf32>
    %cst_9 = arith.constant dense<0.000000e+00> : vector<8xf32>
    %27 = vector.multi_reduction <add>, %26, %cst_9 [0] : vector<4x8xf32> to vector<8xf32>
    %28 = vector.shape_cast %27 : vector<8xf32> to vector<1x8xf32>
    %29 = arith.subf %24, %15 : vector<1x8xf32>
    %cst_10 = arith.constant 0.000000e+00 : f32
    %30 = vector.broadcast %cst_10 : f32 to vector<1x8xf32>
    %31 = arith.subf %30, %29 : vector<1x8xf32>
    %cst_11 = arith.constant -13.8155107 : f32
    %cst_12 = arith.constant -1.00000045E-6 : f32
    %32 = vector.broadcast %cst_11 : f32 to vector<1x8xf32>
    %33 = arith.maximumf %32, %29 : vector<1x8xf32>
    %34 = vector.broadcast %cst_12 : f32 to vector<1x8xf32>
    %35 = arith.minimumf %34, %33 : vector<1x8xf32>
    %cst_13 = arith.constant 0.000000e+00 : f32
    %36 = vector.broadcast %cst_13 : f32 to vector<1x8xf32>
    %37 = arith.subf %36, %35 : vector<1x8xf32>
    %38 = tpu.iota {dimensions = array<i32: 1>} : vector<1x8xi32>
    %c8_i32 = arith.constant 8 : i32
    %39 = arith.muli %arg0, %c8_i32 : i32
    %40 = vector.broadcast %39 : i32 to vector<1x8xi32>
    %41 = arith.addi %40, %38 : vector<1x8xi32>
    %c0_14 = arith.constant 0 : index
    %42 = memref.load %arg1[%c0_14] : memref<1xi32, #tpu.memory_space<smem>>
    %43 = vector.broadcast %42 : i32 to vector<1x8xi32>
    %44 = arith.cmpi slt, %41, %43 : vector<1x8xi32>
    %45 = arith.mulf %28, %31 : vector<1x8xf32>
    %cst_15 = arith.constant 0.000000e+00 : f32
    %46 = vector.broadcast %cst_15 : f32 to vector<1x8xf32>
    %47 = arith.select %44, %45, %46 : vector<1x8xi1>, vector<1x8xf32>
    %cst_16 = arith.constant dense<0.000000e+00> : vector<1xf32>
    %48 = vector.multi_reduction <add>, %47, %cst_16 [1] : vector<1x8xf32> to vector<1xf32>
    %49 = vector.shape_cast %48 : vector<1xf32> to vector<1x1xf32>
    %cst_17 = arith.constant 0.000000e+00 : f32
    %50 = vector.broadcast %cst_17 : f32 to vector<1x8xf32>
    %51 = arith.select %44, %28, %50 : vector<1x8xi1>, vector<1x8xf32>
    %cst_18 = arith.constant dense<0.000000e+00> : vector<1xf32>
    %52 = vector.multi_reduction <add>, %51, %cst_18 [1] : vector<1x8xf32> to vector<1xf32>
    %53 = vector.shape_cast %52 : vector<1xf32> to vector<1x1xf32>
    %cst_19 = arith.constant 0.000000e+00 : f32
    %54 = vector.broadcast %cst_19 : f32 to vector<1x8xf32>
    %55 = arith.select %44, %37, %54 : vector<1x8xi1>, vector<1x8xf32>
    %cst_20 = arith.constant dense<0.000000e+00> : vector<1xf32>
    %56 = vector.multi_reduction <add>, %55, %cst_20 [1] : vector<1x8xf32> to vector<1xf32>
    %57 = vector.shape_cast %56 : vector<1xf32> to vector<1x1xf32>
    %58 = tpu.iota {dimensions = array<i32: 0>} : vector<8x128xi32>
    %c0_i32 = arith.constant 0 : i32
    %59 = vector.broadcast %c0_i32 : i32 to vector<8x128xi32>
    %60 = arith.cmpi eq, %58, %59 : vector<8x128xi32>
    %c1_i32 = arith.constant 1 : i32
    %61 = vector.broadcast %c1_i32 : i32 to vector<8x128xi32>
    %62 = arith.cmpi eq, %58, %61 : vector<8x128xi32>
    %c2_i32 = arith.constant 2 : i32
    %63 = vector.broadcast %c2_i32 : i32 to vector<8x128xi32>
    %64 = arith.cmpi eq, %58, %63 : vector<8x128xi32>
    %cst_21 = arith.constant 0.000000e+00 : f32
    %65 = vector.broadcast %cst_21 : f32 to vector<8x128xf32>
    %66 = vector.shape_cast %57 : vector<1x1xf32> to vector<1x1xf32>
    %67 = vector.broadcast %66 : vector<1x1xf32> to vector<8x128xf32>
    %68 = arith.select %64, %67, %65 : vector<8x128xi1>, vector<8x128xf32>
    %69 = vector.shape_cast %53 : vector<1x1xf32> to vector<1x1xf32>
    %70 = vector.broadcast %69 : vector<1x1xf32> to vector<8x128xf32>
    %71 = arith.select %62, %70, %68 : vector<8x128xi1>, vector<8x128xf32>
    %72 = vector.shape_cast %49 : vector<1x1xf32> to vector<1x1xf32>
    %73 = vector.broadcast %72 : vector<1x1xf32> to vector<8x128xf32>
    %74 = arith.select %60, %73, %71 : vector<8x128xi1>, vector<8x128xf32>
    %c0_22 = arith.constant 0 : index
    %c0_23 = arith.constant 0 : index
    %c0_24 = arith.constant 0 : index
    %75 = vector.load %arg5[%c0_22, %c0_23, %c0_24] : memref<1x8x128xf32, #tpu.memory_space<vmem>>, vector<1x8x128xf32>
    %76 = vector.shape_cast %75 : vector<1x8x128xf32> to vector<8x128xf32>
    %77 = vector.shape_cast %74 : vector<8x128xf32> to vector<1x8x128xf32>
    tpu.vector_store %arg5[%c0_22, %c0_23, %c0_24], %77 {strides = array<i32>} : memref<1x8x128xf32, #tpu.memory_space<vmem>>, vector<1x8x128xf32>,
    return
  }
  func.func @transform_0(%arg0: i32, %arg1: memref<1xi32, #tpu.memory_space<smem>>) -> (i32, i32) {
    %c0_i32 = arith.constant 0 : i32
    %c0_i32_0 = arith.constant 0 : i32
    return %c0_i32, %arg0 : i32, i32
  }
  func.func @transform_1(%arg0: i32, %arg1: memref<1xi32, #tpu.memory_space<smem>>) -> (i32, i32) {
    %c0_i32 = arith.constant 0 : i32
    %c0_i32_0 = arith.constant 0 : i32
    return %c0_i32, %arg0 : i32, i32
  }
  func.func @transform_2(%arg0: i32, %arg1: memref<1xi32, #tpu.memory_space<smem>>) -> (i32, i32) {
    %c0_i32 = arith.constant 0 : i32
    %c0_i32_0 = arith.constant 0 : i32
    %c0_i32_1 = arith.constant 0 : i32
    return %c0_i32, %c0_i32_0 : i32, i32
  }
  func.func @transform_3(%arg0: i32, %arg1: memref<1xi32, #tpu.memory_space<smem>>) -> (i32, i32, i32) {
    %c0_i32 = arith.constant 0 : i32
    %c0_i32_0 = arith.constant 0 : i32
    %c0_i32_1 = arith.constant 0 : i32
    return %arg0, %c0_i32, %c0_i32_0 : i32, i32, i32
  }
}

</mosaic_0001>

<bundles_post_ra>
// kernel: tpu_custom_call.1
= control target key start
LH: loop header
LB: loop body
LE: loop exit
PB: predicated region body
PF: predicated region fallthrough
CT: control target
= control target key end

     0   :  { %10 = vsyncpa [#allocation5], 0  ;;  %s270_s0 = inlined_call_operand.<no memory space> [shape: s32[1], index: 0, kind: input, shape index: {}]   ;;  %s271_s1 = inlined_call_operand.hbm [shape: f32[4,8], index: 1, kind: input, shape index: {}]   ;;  %s272_s2 = inlined_call_operand.vmem [shape: s32[1,8], index: 2, kind: input, shape index: {}]   ;;  %s273_s3 = inlined_call_operand.vmem [shape: f32[4,3], index: 3, kind: input, shape index: {}]   ;;  %s274_s4 = inlined_call_operand.hbm [shape: f32[1,8,128], index: 4, kind: output, shape index: {}]  }
   0x1   :  { %11 = vsyncpa [#allocation6], 0  ;;  %s201_s15 = smov [#allocation4]  }
   0x2   :  { %s18_s16 = sshll.u32 %s201_s15, 4  ;;  %s19_s16 = int_to_ptr.vmem [resolvable:$true] %s18_s16 }
   0x3   :  { %s165_s17 = scalar_lea.vmem %s19_s16, 64  ;;  %p170_p1 = scmp.lt.s32.totalorder %s19_s16, %s19_s16 }
   0x4   :  { %p166_p0 = scmp.ne.s32.totalorder %s19_s16, %s165_s17  ;;  %p171_p2 = scmp.lt.s32.totalorder %s165_s17, %s165_s17 }
   0x6   :  { %p172_p3 = por %p171_p2, %p170_p1 }
   0x8   :  { %p173_p4 = pnand %p172_p3, %p166_p0 }
   0xa   :  { %176 = shalt.err (!%p173_p4)
}
   0xb   :  { %21 = dma.hbm_to_vmem [thread:$0]  %s271_s1, 64, %s19_s16, [#allocation5]  }
   0xc   :  { %197 = dma.done.wait [#allocation5], 64  }
   0xd   :  { %198 = vsyncadd [#allocation5], 4294967232  ;;  %v202_v0 = vmov 0   ;;  %v203_v1 = vmov 2   ;;  %v30_v2 = vld [vmem:[%s273_s3] sm:$0xf]  ;;  %v63_v4 = vlaneseq  ;;  %v103_v24 = vstv %s270_s0 }
   0xe   :  { %149 = vset.pattern.permute.xlu0 %v202_v0  ;;  %151 = vset.pattern.permute.xlu1 %v203_v1  ;;  %v204_v3 = vmov 1   ;;  %v141_v6 = vld [vmem:[%s272_s2] ss:$0 sm:$0xff]  ;;  %v205_v8 = vmov 0.0   ;;  %vm42_vm1 = vcmask 60416   ;;  %vm107_vm3 = vcmask 64512  }
   0xf   :  { %33 = vperm.xlu0 %149, %v30_v2   ;;  %81 = vperm.xlu1 %151, %v30_v2   ;;  %v238_v5 = vshrl.u32 %v63_v4, 7  ;;  %v29_v11 = vld [vmem:[#allocation4] sm:$0xf]  ;;  %v98_v22 = vand.u32 127, %v63_v4  ;;  %s206_s0 = smov [#allocation7]  }
  0x10   :  { %s132_s23 = sshll.u32 %s206_s0, 4  ;;  %s133_s23 = int_to_ptr.vmem [resolvable:$true] %s132_s23 }
  0x11   :  { %vm69_vm0 = vcmp.eq.s32.totalorder %v238_v5, %v141_v6  ;;  %vm249_vm2 = vcmp.lt.s32.totalorder %v98_v22, %v103_v24  ;;  %vm121_vm4 = vcmp.eq.s32.totalorder %v238_v5, 2  ;;  %vm120_vm5 = vcmp.eq.s32.totalorder %v238_v5, 1  ;;  %s177_s24 = scalar_lea.vmem %s133_s23, 128  ;;  %p182_p6 = scmp.lt.s32.totalorder %s133_s23, %s133_s23 }
  0x12   :  { %v142_v9 = vsel %vm69_vm0, 1.0, %v205_v8  ;;  %vm119_vm6 = vcmp.eq.s32.totalorder %v238_v5, 0  ;;  %p178_p5 = scmp.ne.s32.totalorder %s133_s23, %s177_s24  ;;  %p183_p7 = scmp.lt.s32.totalorder %s177_s24, %s177_s24 }
  0x13   :  { %150 = vset.pattern.permute.xlu0 %v204_v3 }
  0x14   :  { %38 = vperm.xlu0 %150, %v30_v2   ;;  %p184_p8 = por %p183_p7, %p182_p6 }
  0x16   :  { %p185_p9 = pnand %p184_p8, %p178_p5 }
  0x18   :  { %152 = vset.pattern.permute.xlu0 %v203_v1 }
  0x8a   :  { %v34_v7 = vpop.permute.xlu0 %33  ;;  %v82_v10 = vpop.permute.xlu1 %81 }
  0x8b   :  { %v84_v12 = vmul.f32 %v142_v9, %v82_v10  ;;  %v36_v14 = vmul.f32 %v34_v7, %v29_v11 }
  0x8d   :  { %v85_v13 = vsel %vm42_vm1, %v84_v12, 0.0 }
  0x8e   :  { %v86_v15 = vrot.slane %v85_v13, 4 }
  0x8f   :  { %v39_v16 = vpop.permute.xlu0 %38 }
  0x90   :  { %v41_v17 = vadd.f32 %v39_v16, %v36_v14  ;;  %v87_v18 = vadd.f32 %v86_v15, %v85_v13 }
  0x92   :  { %v43_v19 = vsel %vm42_vm1, %v41_v17, -inf  ;;  %v88_v20 = vrot.slane %v87_v18, 2 }
  0x93   :  { %v44_v21 = vrot.slane %v43_v19, 4 }
  0x94   :  { %v89_v23 = vadd.f32 %v88_v20, %v87_v18 }
  0x95   :  { %v45_v25 = vmax.f32 %v43_v19, %v44_v21 }
  0x96   :  { %v90_v26 = vrot.slane %v89_v23, 1 }
  0x97   :  { %v46_v27 = vrot.slane %v45_v25, 2 }
  0x98   :  { %v91_v29 = vadd.f32 %v90_v26, %v89_v23 }
  0x99   :  { %v47_v30 = vmax.f32 %v45_v25, %v46_v27 }
  0x9a   :  { %v111_v31 = vsel %vm249_vm2, %v91_v29, 0.0 }
  0x9b   :  { %v48_v32 = vrot.slane %v47_v30, 1  ;;  %v112_v33 = vsel %vm107_vm3, %v111_v31, 0.0 }
  0x9c   :  { %113 = vadd.xlane.f32.xlu0 %v112_v33 }
  0x9d   :  { %v49_v34 = vmax.f32 %v47_v30, %v48_v32 }
  0x9f   :  { %v50_v35 = vsub.f32 %v41_v17, %v49_v34 }
  0xa1   :  { %v51_v36 = vmul.f32 1.442695, %v50_v35  ;;  %v72_v39 = vmul.f32 %v142_v9, %v50_v35 }
  0xa3   :  { %153 = vpow2.f32 %v51_v36  ;;  %v73_v42 = vsel %vm42_vm1, %v72_v39, 0.0 }
  0xa4   :  { %v74_v45 = vrot.slane %v73_v42, 4 }
  0xa6   :  { %v75_v47 = vadd.f32 %v74_v45, %v73_v42 }
  0xa8   :  { %v76_v49 = vrot.slane %v75_v47, 2 }
  0xaa   :  { %v77_v50 = vadd.f32 %v76_v49, %v75_v47 }
  0xac   :  { %v78_v51 = vrot.slane %v77_v50, 1 }
  0xae   :  { %v79_v54 = vadd.f32 %v78_v51, %v77_v50 }
  0xb0   :  { %v154_v37 = vpop.eup %153 }
  0xb1   :  { %v53_v38 = vsel %vm42_vm1, %v154_v37, 0.0 }
  0xb2   :  { %v54_v40 = vrot.slane %v53_v38, 4 }
  0xb4   :  { %v55_v41 = vadd.f32 %v54_v40, %v53_v38 }
  0xb6   :  { %v56_v43 = vrot.slane %v55_v41, 2 }
  0xb8   :  { %v57_v44 = vadd.f32 %v56_v43, %v55_v41 }
  0xba   :  { %v58_v46 = vrot.slane %v57_v44, 1 }
  0xbc   :  { %v59_v48 = vadd.f32 %v58_v46, %v57_v44 }
  0xbe   :  { %155 = vlog2.f32 %v59_v48 }
  0xcb   :  { %v156_v52 = vpop.eup %155 }
  0xcc   :  { %v61_v53 = vmul.f32 0.6931472, %v156_v52 }
  0xce   :  { %v92_v55 = vsub.f32 %v79_v54, %v61_v53 }
  0xd0   :  { %v94_v56 = vmax.f32 %v92_v55, -13.815511  ;;  %v93_v57 = vsub.f32 0.0, %v92_v55 }
  0xd2   :  { %v95_v58 = vmin.f32 %v94_v56, -1.0000005e-06  ;;  %v105_v59 = vmul.f32 %v93_v57, %v91_v29 }
  0xd4   :  { %v96_v60 = vsub.f32 0.0, %v95_v58  ;;  %v106_v61 = vsel %vm249_vm2, %v105_v59, 0.0 }
  0xd5   :  { %v108_v62 = vsel %vm107_vm3, %v106_v61, 0.0 }
  0xd6   :  { %v115_v63 = vsel %vm249_vm2, %v96_v60, 0.0 }
  0xd7   :  { %v116_v0 = vsel %vm107_vm3, %v115_v63, 0.0 }
  0xd8   :  { %117 = vadd.xlane.f32.xlu1 %v116_v0 }
  0xdc   :  { %109 = vadd.xlane.f32.xlu1 %v108_v62 }
 0x125   :  { %v114_v3 = vpop.xlane.xlu0 %113 }
 0x161   :  { %v118_v1 = vpop.xlane.xlu1 %117 }
 0x162   :  { %v122_v2 = vsel %vm121_vm4, %v118_v1, 0.0 }
 0x163   :  { %v123_v4 = vsel %vm120_vm5, %v114_v3, %v122_v2 }
 0x165   :  { %v110_v6 = vpop.xlane.xlu1 %109 }
 0x166   :  { %v124_v7 = vsel %vm119_vm6, %v110_v6, %v123_v4 }
 0x167   :  { %125 = vst [vmem:[#allocation7] sm:$0xff] %v124_v7 }
 0x168   :  { %188 = shalt.err (!%p185_p9)
}
 0x169   :  { %135 = dma.vmem_to_hbm [thread:$0]  %s133_s23, 128, %s274_s4, [#allocation6]  }
 0x16a   :  { %199 = dma.done.wait [#allocation6], 128  }
 0x16b   :  { %200 = vsyncadd [#allocation6], 4294967168 }
 0x16c   :  { %139 = vsyncpa [#allocation5], 1 }
 0x16d   :  { %140 = vsyncpa [#allocation6], 1 }

</bundles_post_ra>
